<compile_context>
chip_gen: v6e
topology: v6e:2x2x1
jax: 0.10.0
libtpu: 0.0.40
codegen_flags: <defaults>
</compile_context>

<pallas_src>
import math

import jax
import jax.numpy as jnp
from jax.experimental import pallas as pl
from jax.experimental.pallas import tpu as pltpu

HIDDEN = 256
TM_MAX = 1024                      # hard cap on rows per batch tile
VMEM_BUDGET = 20 * 1024 * 1024     # bytes we budget tiles + resident weights against
VMEM_LIMIT = 32 * 1024 * 1024      # scoped VMEM requested from Mosaic (ok on v5e/v6e/v7x)

# Resident (constant index_map) operands gain nothing from double buffering; single-buffer
# them when the installed Pallas supports pipeline_mode. Validated at import time.
_RESIDENT = {}
_WEIGHT_BUFS = 2
if hasattr(pl, "Buffered"):
    try:
        pl.BlockSpec((8, 128), lambda i: (0, 0), pipeline_mode=pl.Buffered(1))
        _RESIDENT = {"pipeline_mode": pl.Buffered(1)}
        _WEIGHT_BUFS = 1
    except Exception:
        pass


def _round_up(x, m):
    return ((x + m - 1) // m) * m


def _mlp_kernel(x_ref, w1_ref, b1_ref, w2_ref, b2_ref, w3_ref, b3_ref, o_ref):
    # x may arrive as f32 (no-copy path) or bf16 (padded copy); cast rides the VPU.
    x = x_ref[...].astype(jnp.bfloat16)
    # layer 1: bf16 operands, f32 MXU accumulate, bf16 epilogue (bias + ReLU)
    h1 = jnp.dot(x, w1_ref[...], preferred_element_type=jnp.float32).astype(jnp.bfloat16)
    h1 = jnp.maximum(h1 + b1_ref[...], 0.0)
    # layer 2
    h2 = jnp.dot(h1, w2_ref[...], preferred_element_type=jnp.float32).astype(jnp.bfloat16)
    h2 = jnp.maximum(h2 + b2_ref[...], 0.0)
    # layer 3 (no activation): f32 bias add, f32 store
    o_ref[...] = jnp.dot(h2, w3_ref[...], preferred_element_type=jnp.float32) + b3_ref[...]


def prepare_params(params, pad_output_to_lanes=False):
    """One-time parameter prep (hoisted out of the per-call hot path).

    `params` = (w1, b1, w2, b2, w3, b3) with weights laid out (in_features, out_features)
    (transpose of PyTorch nn.Linear) and biases of shape (out,) or (1, out).
    Set pad_output_to_lanes=True to lane-pad the last layer to a multiple of 128
    (better on MXU-bound v5e; costs extra f32 writeback on HBM-bound v6e/v7x).
    """
    w1, b1, w2, b2, w3, b3 = (jnp.asarray(p) for p in params)
    out_dim = w3.shape[-1]
    out_cols = _round_up(out_dim, 128) if pad_output_to_lanes else out_dim
    pad = out_cols - out_dim
    b3f = b3.reshape(1, -1).astype(jnp.float32)
    w3f = w3.astype(jnp.float32)
    if pad:
        w3f = jnp.pad(w3f, ((0, 0), (0, pad)))
        b3f = jnp.pad(b3f, ((0, 0), (0, pad)))
    return (
        w1.astype(jnp.bfloat16),
        b1.reshape(1, -1).astype(jnp.bfloat16),
        w2.astype(jnp.bfloat16),
        b2.reshape(1, -1).astype(jnp.bfloat16),
        w3f.astype(jnp.bfloat16),
        b3f,
    )


def feedforward_nn_256(obs, prepared, out_dim=None):
    """Forward pass equivalent to FeedForwardNN_256.forward (odometer omitted).

    `prepared` comes from prepare_params. `out_dim` only needs to be passed when
    prepare_params was called with pad_output_to_lanes=True.
    """
    w1, b1, w2, b2, w3, b3 = prepared
    obs = jnp.asarray(obs, dtype=jnp.float32)
    squeeze = obs.ndim == 1          # mirrors obs.unsqueeze(0)
    if squeeze:
        obs = obs[None, :]

    batch, in_dim = obs.shape
    out_cols = w3.shape[1]
    if out_dim is None:
        out_dim = out_cols

    # ---- tiling: >=2 grid steps once padded batch >= 512 (megacore / pipeline overlap),
    # ~4-8 steps for large batches, bounded by an explicit VMEM budget.
    padded = max(8, _round_up(batch, 8))
    n_steps = 1 if padded < 512 else min(8, max(2, padded // 512))
    weight_bytes = _WEIGHT_BUFS * (
        2 * (in_dim * HIDDEN + HIDDEN * HIDDEN + HIDDEN * out_cols)   # bf16 weights
        + 2 * 2 * HIDDEN + 4 * out_cols)                              # biases
    per_row_bytes = (
        2 * 4 * in_dim          # x tile, double buffered, f32 worst case
        + 2 * 4 * out_cols      # out tile, double buffered, f32
        + 2 * 2 * HIDDEN        # h1, h2 live in bf16
        + 4 * HIDDEN)           # one f32 MXU result before the bf16 cast
    tm_budget = max(8, (VMEM_BUDGET - weight_bytes) // per_row_bytes)
    tm = _round_up(pl.cdiv(padded, n_steps), 8)
    tm = max(8, min(tm, tm_budget, TM_MAX))
    grid_steps = pl.cdiv(padded, tm)
    tm = _round_up(pl.cdiv(padded, grid_steps), 8)     # shrink tm -> minimal padding waste
    padded = grid_steps * tm

    # ---- input: no copy when obs already tiles exactly; otherwise one fused pad +
    # bf16 cast (rows aligned to the bf16 sublane tile).
    if padded == batch:
        x_in = obs
    else:
        tm = _round_up(tm, 16)
        padded = grid_steps * tm
        x_in = jnp.zeros((padded, in_dim), jnp.bfloat16).at[:batch].set(
            obs.astype(jnp.bfloat16))

    flops = 2 * padded * (in_dim * HIDDEN + HIDDEN * HIDDEN + HIDDEN * out_cols)
    bytes_accessed = (
        x_in.size * x_in.dtype.itemsize
        + 2 * (w1.size + w2.size + w3.size) + 2 * (b1.size + b2.size) + 4 * b3.size
        + padded * out_cols * 4)

    out = pl.pallas_call(
        _mlp_kernel,
        out_shape=jax.ShapeDtypeStruct((padded, out_cols), jnp.float32),
        grid=(grid_steps,),
        in_specs=[
            pl.BlockSpec((tm, in_dim), lambda i: (i, 0)),                    # x: batch tiled
            pl.BlockSpec((in_dim, HIDDEN), lambda i: (0, 0), **_RESIDENT),   # w1 (resident)
            pl.BlockSpec((1, HIDDEN), lambda i: (0, 0), **_RESIDENT),        # b1
            pl.BlockSpec((HIDDEN, HIDDEN), lambda i: (0, 0), **_RESIDENT),   # w2
            pl.BlockSpec((1, HIDDEN), lambda i: (0, 0), **_RESIDENT),        # b2
            pl.BlockSpec((HIDDEN, out_cols), lambda i: (0, 0), **_RESIDENT), # w3
            pl.BlockSpec((1, out_cols), lambda i: (0, 0), **_RESIDENT),      # b3
        ],
        out_specs=pl.BlockSpec((tm, out_cols), lambda i: (i, 0)),
        compiler_params=pltpu.CompilerParams(
            dimension_semantics=("parallel",),        # shard batch tiles across TCs (v7x)
            vmem_limit_bytes=VMEM_LIMIT),
        cost_estimate=pl.CostEstimate(
            flops=flops, transcendentals=0, bytes_accessed=bytes_accessed),
    )(x_in, w1, b1, w2, b2, w3, b3)

    if padded != batch or out_cols != out_dim:
        out = out[:batch, :out_dim]
    if squeeze:
        out = out[0]
    return out


def init_params(key, in_dim, out_dim, hidden=HIDDEN):
    """Deterministic init mimicking nn.Linear's default U(-1/sqrt(fan_in), 1/sqrt(fan_in)).

    Weights stored as (in_features, out_features) (transpose of PyTorch layout)."""
    keys = jax.random.split(key, 6)

    def linear(kw, kb, fan_in, fan_out):
        bound = 1.0 / math.sqrt(fan_in)
        w = jax.random.uniform(kw, (fan_in, fan_out), jnp.float32, -bound, bound)
        b = jax.random.uniform(kb, (1, fan_out), jnp.float32, -bound, bound)
        return w, b

    w1, b1 = linear(keys[0], keys[1], in_dim, hidden)
    w2, b2 = linear(keys[2], keys[3], hidden, hidden)
    w3, b3 = linear(keys[4], keys[5], hidden, out_dim)
    return (w1, b1, w2, b2, w3, b3)


if __name__ == "__main__":
    key = jax.random.PRNGKey(0)
    k_param, k_obs = jax.random.split(key)

    in_dim, out_dim, batch = 32, 8, 4
    raw_params = init_params(k_param, in_dim, out_dim)
    w1, b1, w2, b2, w3, b3 = raw_params
    prepared = prepare_params(raw_params)     # one-time prep, hoisted off the hot path

    forward = jax.jit(feedforward_nn_256)

    obs = jax.random.normal(k_obs, (batch, in_dim), dtype=jnp.float32)
    out = forward(obs, prepared)
    jax.block_until_ready(out)
    assert out.shape == (batch, out_dim)

    # Reference with the same mixed-precision numerics as the kernel.
    def ref_mixed(x):
        xb = x.astype(jnp.bfloat16)
        h1 = jnp.maximum(
            jnp.dot(xb, w1.astype(jnp.bfloat16),
                    preferred_element_type=jnp.float32).astype(jnp.bfloat16)
            + b1.astype(jnp.bfloat16), 0.0)
        h2 = jnp.maximum(
            jnp.dot(h1, w2.astype(jnp.bfloat16),
                    preferred_element_type=jnp.float32).astype(jnp.bfloat16)
            + b2.astype(jnp.bfloat16), 0.0)
        return jnp.dot(h2, w3.astype(jnp.bfloat16),
                       preferred_element_type=jnp.float32) + b3

    def ref_f32(x):
        h1 = jnp.maximum(x @ w1 + b1, 0.0)
        h2 = jnp.maximum(h1 @ w2 + b2, 0.0)
        return h2 @ w3 + b3

    assert jnp.allclose(out, ref_mixed(obs), atol=2e-3, rtol=2e-3), (
        float(jnp.max(jnp.abs(out - ref_mixed(obs)))))
    # Loose check vs. the full-f32 reference (bf16 operand rounding ~1e-2 rel).
    assert jnp.allclose(out, ref_f32(obs), atol=5e-2, rtol=5e-2)

    # 1-D input round-trips to (out_dim,) like the PyTorch module.
    out_1d = forward(obs[0], prepared)
    jax.block_until_ready(out_1d)
    assert out_1d.shape == (out_dim,)
    assert jnp.allclose(out_1d, out[0], atol=2e-3, rtol=2e-3)

    # Multi-step grid + no-copy f32 input path (batch = 528 -> 2 tiles of 264 rows).
    obs_big = jax.random.normal(jax.random.PRNGKey(1), (528, in_dim), dtype=jnp.float32)
    out_big = forward(obs_big, prepared)
    jax.block_until_ready(out_big)
    assert out_big.shape == (528, out_dim)
    assert jnp.allclose(out_big, ref_mixed(obs_big), atol=2e-3, rtol=2e-3)

    print("KERNEL_OK")
</pallas_src>

<mosaic_0001>
module attributes {stable_mosaic.version = 11 : i64} {
  func.func @_mlp_kernel(%arg0: i32, %arg1: memref<16x32xbf16, #tpu.memory_space<vmem>>, %arg2: memref<32x256xbf16, #tpu.memory_space<vmem>>, %arg3: memref<1x256xbf16, #tpu.memory_space<vmem>>, %arg4: memref<256x256xbf16, #tpu.memory_space<vmem>>, %arg5: memref<1x256xbf16, #tpu.memory_space<vmem>>, %arg6: memref<256x8xbf16, #tpu.memory_space<vmem>>, %arg7: memref<1x8xf32, #tpu.memory_space<vmem>>, %arg8: memref<16x8xf32, #tpu.memory_space<vmem>>) attributes {dimension_semantics = [#tpu.dimension_semantics<parallel>], iteration_bounds = array<i64: 1>, scalar_prefetch = 0 : i64, scratch_operands = 0 : i64, tpu.core_type = #tpu.core_type<tc>, window_params = [{transform_indices = @transform_0, window_bounds = array<i64: 16, 32>}, {pipeline_mode = #tpu.pipeline_mode<synchronous>, transform_indices = @transform_1, window_bounds = array<i64: 32, 256>}, {pipeline_mode = #tpu.pipeline_mode<synchronous>, transform_indices = @transform_2, window_bounds = array<i64: 1, 256>}, {pipeline_mode = #tpu.pipeline_mode<synchronous>, transform_indices = @transform_3, window_bounds = array<i64: 256, 256>}, {pipeline_mode = #tpu.pipeline_mode<synchronous>, transform_indices = @transform_4, window_bounds = array<i64: 1, 256>}, {pipeline_mode = #tpu.pipeline_mode<synchronous>, transform_indices = @transform_5, window_bounds = array<i64: 256, 8>}, {pipeline_mode = #tpu.pipeline_mode<synchronous>, transform_indices = @transform_6, window_bounds = array<i64: 1, 8>}, {transform_indices = @transform_7, window_bounds = array<i64: 16, 8>}]} {
    %c0 = arith.constant 0 : index
    %c0_0 = arith.constant 0 : index
    %0 = vector.load %arg1[%c0, %c0_0] : memref<16x32xbf16, #tpu.memory_space<vmem>>, vector<16x32xbf16>
    %c0_1 = arith.constant 0 : index
    %c0_2 = arith.constant 0 : index
    %1 = vector.load %arg2[%c0_1, %c0_2] : memref<32x256xbf16, #tpu.memory_space<vmem>>, vector<32x256xbf16>
    %cst = arith.constant dense<0.000000e+00> : vector<16x256xf32>
    %2 = tpu.matmul %0, %1, %cst {dimension_numbers = #tpu.dot_dimension_numbers<[1], [0], [0], [1], [0, 0, 1, 1], [], []>} : vector<16x32xbf16>, vector<32x256xbf16>, vector<16x256xf32> -> vector<16x256xf32>
    %3 = arith.truncf %2 : vector<16x256xf32> to vector<16x256xbf16>
    %c0_3 = arith.constant 0 : index
    %c0_4 = arith.constant 0 : index
    %4 = vector.load %arg3[%c0_3, %c0_4] : memref<1x256xbf16, #tpu.memory_space<vmem>>, vector<1x256xbf16>
    %5 = vector.broadcast %4 : vector<1x256xbf16> to vector<16x256xbf16>
    %6 = arith.addf %3, %5 : vector<16x256xbf16>
    %cst_5 = arith.constant 0.000000e+00 : bf16
    %7 = vector.broadcast %cst_5 : bf16 to vector<16x256xbf16>
    %8 = arith.maximumf %6, %7 : vector<16x256xbf16>
    %c0_6 = arith.constant 0 : index
    %c0_7 = arith.constant 0 : index
    %9 = vector.load %arg4[%c0_6, %c0_7] : memref<256x256xbf16, #tpu.memory_space<vmem>>, vector<256x256xbf16>
    %cst_8 = arith.constant dense<0.000000e+00> : vector<16x256xf32>
    %10 = tpu.matmul %8, %9, %cst_8 {dimension_numbers = #tpu.dot_dimension_numbers<[1], [0], [0], [1], [0, 0, 1, 1], [], []>} : vector<16x256xbf16>, vector<256x256xbf16>, vector<16x256xf32> -> vector<16x256xf32>
    %11 = arith.truncf %10 : vector<16x256xf32> to vector<16x256xbf16>
    %c0_9 = arith.constant 0 : index
    %c0_10 = arith.constant 0 : index
    %12 = vector.load %arg5[%c0_9, %c0_10] : memref<1x256xbf16, #tpu.memory_space<vmem>>, vector<1x256xbf16>
    %13 = vector.broadcast %12 : vector<1x256xbf16> to vector<16x256xbf16>
    %14 = arith.addf %11, %13 : vector<16x256xbf16>
    %cst_11 = arith.constant 0.000000e+00 : bf16
    %15 = vector.broadcast %cst_11 : bf16 to vector<16x256xbf16>
    %16 = arith.maximumf %14, %15 : vector<16x256xbf16>
    %c0_12 = arith.constant 0 : index
    %c0_13 = arith.constant 0 : index
    %17 = vector.load %arg6[%c0_12, %c0_13] : memref<256x8xbf16, #tpu.memory_space<vmem>>, vector<256x8xbf16>
    %cst_14 = arith.constant dense<0.000000e+00> : vector<16x8xf32>
    %18 = tpu.matmul %16, %17, %cst_14 {dimension_numbers = #tpu.dot_dimension_numbers<[1], [0], [0], [1], [0, 0, 1, 1], [], []>} : vector<16x256xbf16>, vector<256x8xbf16>, vector<16x8xf32> -> vector<16x8xf32>
    %c0_15 = arith.constant 0 : index
    %c0_16 = arith.constant 0 : index
    %19 = vector.load %arg7[%c0_15, %c0_16] : memref<1x8xf32, #tpu.memory_space<vmem>>, vector<1x8xf32>
    %20 = vector.broadcast %19 : vector<1x8xf32> to vector<16x8xf32>
    %21 = arith.addf %18, %20 : vector<16x8xf32>
    %c0_17 = arith.constant 0 : index
    %c0_18 = arith.constant 0 : index
    %22 = vector.load %arg8[%c0_17, %c0_18] : memref<16x8xf32, #tpu.memory_space<vmem>>, vector<16x8xf32>
    tpu.vector_store %arg8[%c0_17, %c0_18], %21 {strides = array<i32>} : memref<16x8xf32, #tpu.memory_space<vmem>>, vector<16x8xf32>,
    return
  }
  func.func @transform_0(%arg0: i32) -> (i32, i32) {
    %c0_i32 = arith.constant 0 : i32
    %c0_i32_0 = arith.constant 0 : i32
    return %arg0, %c0_i32 : i32, i32
  }
  func.func @transform_1(%arg0: i32) -> (i32, i32) {
    %c0_i32 = arith.constant 0 : i32
    %c0_i32_0 = arith.constant 0 : i32
    %c0_i32_1 = arith.constant 0 : i32
    return %c0_i32, %c0_i32_0 : i32, i32
  }
  func.func @transform_2(%arg0: i32) -> (i32, i32) {
    %c0_i32 = arith.constant 0 : i32
    %c0_i32_0 = arith.constant 0 : i32
    %c0_i32_1 = arith.constant 0 : i32
    return %c0_i32, %c0_i32_0 : i32, i32
  }
  func.func @transform_3(%arg0: i32) -> (i32, i32) {
    %c0_i32 = arith.constant 0 : i32
    %c0_i32_0 = arith.constant 0 : i32
    %c0_i32_1 = arith.constant 0 : i32
    return %c0_i32, %c0_i32_0 : i32, i32
  }
  func.func @transform_4(%arg0: i32) -> (i32, i32) {
    %c0_i32 = arith.constant 0 : i32
    %c0_i32_0 = arith.constant 0 : i32
    %c0_i32_1 = arith.constant 0 : i32
    return %c0_i32, %c0_i32_0 : i32, i32
  }
  func.func @transform_5(%arg0: i32) -> (i32, i32) {
    %c0_i32 = arith.constant 0 : i32
    %c0_i32_0 = arith.constant 0 : i32
    %c0_i32_1 = arith.constant 0 : i32
    return %c0_i32, %c0_i32_0 : i32, i32
  }
  func.func @transform_6(%arg0: i32) -> (i32, i32) {
    %c0_i32 = arith.constant 0 : i32
    %c0_i32_0 = arith.constant 0 : i32
    %c0_i32_1 = arith.constant 0 : i32
    return %c0_i32, %c0_i32_0 : i32, i32
  }
  func.func @transform_7(%arg0: i32) -> (i32, i32) {
    %c0_i32 = arith.constant 0 : i32
    %c0_i32_0 = arith.constant 0 : i32
    return %arg0, %c0_i32 : i32, i32
  }
}

</mosaic_0001>

<bundles_post_ra>
// kernel: feedforward_nn_256.1
= control target key start
LH: loop header
LB: loop body
LE: loop exit
PB: predicated region body
PF: predicated region fallthrough
CT: control target
= control target key end

     0   :  { %12 = vsyncpa [#allocation3], 0  ;;  %s803_s24 = smov [#allocation2]   ;;  %s934_s0 = inlined_call_operand.vmem [shape: bf16[16,32], index: 0, kind: input, shape index: {}]   ;;  %s935_s1 = inlined_call_operand.vmem [shape: bf16[32,256], index: 1, kind: input, shape index: {}]   ;;  %s936_s2 = inlined_call_operand.vmem [shape: bf16[1,256], index: 2, kind: input, shape index: {}]   ;;  %s937_s3 = inlined_call_operand.hbm [shape: bf16[256,256], index: 3, kind: input, shape index: {}]   ;;  %s938_s4 = inlined_call_operand.vmem [shape: bf16[1,256], index: 4, kind: input, shape index: {}]   ;;  %s939_s5 = inlined_call_operand.vmem [shape: bf16[256,8], index: 5, kind: input, shape index: {}]   ;;  %s940_s6 = inlined_call_operand.vmem [shape: f32[1,8], index: 6, kind: input, shape index: {}]   ;;  %s941_s7 = inlined_call_operand.vmem [shape: f32[16,8], index: 7, kind: output, shape index: {}]  }
   0x1   :  { %s24_s25 = sshll.u32 %s803_s24, 4  ;;  %s25_s25 = int_to_ptr.vmem [resolvable:$true] %s24_s25 }
   0x2   :  { %s789_s26 = scalar_lea.vmem %s25_s25, 4096  ;;  %p794_p1 = scmp.lt.s32.totalorder %s25_s25, %s25_s25 }
   0x3   :  { %p790_p0 = scmp.ne.s32.totalorder %s25_s25, %s789_s26  ;;  %p795_p2 = scmp.lt.s32.totalorder %s789_s26, %s789_s26 }
   0x5   :  { %p796_p3 = por %p795_p2, %p794_p1 }
   0x7   :  { %p797_p4 = pnand %p796_p3, %p790_p0 }
   0x9   :  { %800 = shalt.err (!%p797_p4)
}
   0xa   :  { %s804_s27 = smov 128   ;;  %s805_s28 = smov 8  }
   0xb   :  { %30 = dma.hbm_to_vmem [thread:$0]  %s937_s3, 4096, %s25_s25, [#allocation3], %s804_s27, %s804_s27, %s805_s28  }
   0xc   :  { %801 = dma.done.wait [#allocation3], 4096  }
   0xd   :  { %802 = vsyncadd [#allocation3], 4294963200  ;;  %v806_v0 = vmov 0   ;;  %v710_v1 = vld [vmem:[%s935_s1 + $0x14] ss:$8 sps:$4 sm:$0xff]   ;;  %v716_v8 = vld [vmem:[%s934_s0] sm:$0xff]   ;;  %v134_v50 = vlaneseq }
   0xe   :  { %108 = vmatprep.mubr.bf16.mxu0 %v806_v0  ;;  %v712_v2 = vld [vmem:[%s935_s1 + $0x10] ss:$8 sps:$4 sm:$0xff]   ;;  %88 = vmatprep.subr.bf16.mxu0 %v710_v1  ;;  %v713_v3 = vld [vmem:[%s935_s1 + $0x4] ss:$8 sps:$4 sm:$0xff]   ;;  %v715_v4 = vld [vmem:[%s935_s1] ss:$8 sps:$4 sm:$0xff]  }
   0xf   :  { %89 = vmatpush1.bf16.msra.mxu0 %v712_v2  ;;  %v717_v5 = vld [vmem:[#allocation2 + $0x74] ss:$8 sps:$4 sm:$0xff]   ;;  %v719_v6 = vld [vmem:[#allocation2 + $0x70] ss:$8 sps:$4 sm:$0xff]   ;;  %v720_v7 = vld [vmem:[#allocation2 + $0x64] ss:$8 sps:$4 sm:$0xff]  }
  0x10   :  { %90 = vmatprep.subr.bf16.mxu0 %v713_v3  ;;  %355 = vmatprep.subr.bf16.mxu1 %v717_v5  ;;  %vm72_vm0 = vcmask 261120   ;;  %v722_v9 = vld [vmem:[#allocation2 + $0x60] ss:$8 sps:$4 sm:$0xff]   ;;  %v723_v10 = vld [vmem:[#allocation2 + $0x54] ss:$8 sps:$4 sm:$0xff]   ;;  %v135_v52 = vshrl.u32 %v134_v50, 7 }
  0x11   :  { %356 = vmatpush1.bf16.msra.mxu1 %v719_v6  ;;  %v725_v11 = vld [vmem:[#allocation2 + $0x50] ss:$8 sps:$4 sm:$0xff]   ;;  %v726_v12 = vld [vmem:[#allocation2 + $0x44] ss:$8 sps:$4 sm:$0xff]   ;;  %v728_v13 = vld [vmem:[#allocation2 + $0x40] ss:$8 sps:$4 sm:$0xff]  }
  0x12   :  { %357 = vmatprep.subr.bf16.mxu1 %v720_v7  ;;  %v729_v14 = vld [vmem:[#allocation2 + $0x34] ss:$8 sps:$4 sm:$0xff]   ;;  %v731_v15 = vld [vmem:[#allocation2 + $0x30] ss:$8 sps:$4 sm:$0xff]   ;;  %v732_v16 = vld [vmem:[#allocation2 + $0x24] ss:$8 sps:$4 sm:$0xff]  }
  0x13   :  { %91 = vmatpush1.bf16.msra.mxu0 %v715_v4  ;;  %v734_v17 = vld [vmem:[#allocation2 + $0x20] ss:$8 sps:$4 sm:$0xff]   ;;  %v735_v18 = vld [vmem:[#allocation2 + $0x14] ss:$8 sps:$4 sm:$0xff]   ;;  %v737_v19 = vld [vmem:[#allocation2 + $0x10] ss:$8 sps:$4 sm:$0xff]  }
  0x14   :  { %v738_v20 = vld [vmem:[#allocation2 + $0x4] ss:$8 sps:$4 sm:$0xff]   ;;  %v740_v21 = vld [vmem:[#allocation2] ss:$8 sps:$4 sm:$0xff]   ;;  %v741_v22 = vld [vmem:[#allocation2 + $0xf4] ss:$8 sps:$4 sm:$0xff]  }
  0x15   :  { %358 = vmatpush1.bf16.msra.mxu1 %v722_v9  ;;  %v743_v23 = vld [vmem:[#allocation2 + $0xf0] ss:$8 sps:$4 sm:$0xff]   ;;  %v744_v24 = vld [vmem:[#allocation2 + $0xe4] ss:$8 sps:$4 sm:$0xff]   ;;  %v746_v25 = vld [vmem:[#allocation2 + $0xe0] ss:$8 sps:$4 sm:$0xff]  }
  0x16   :  { %631 = vmatmul.mubr.msk.bf16.vlgmr.msra.gmra.mxu0 %vm72_vm0, %v716_v8  ;;  %359 = vmatprep.subr.bf16.mxu1 %v723_v10  ;;  %v747_v26 = vld [vmem:[#allocation2 + $0xd4] ss:$8 sps:$4 sm:$0xff]   ;;  %v749_v27 = vld [vmem:[#allocation2 + $0xd0] ss:$8 sps:$4 sm:$0xff]   ;;  %v750_v28 = vld [vmem:[#allocation2 + $0xc4] ss:$8 sps:$4 sm:$0xff]  }
  0x17   :  { %v752_v29 = vld [vmem:[#allocation2 + $0xc0] ss:$8 sps:$4 sm:$0xff]   ;;  %v753_v30 = vld [vmem:[#allocation2 + $0xb4] ss:$8 sps:$4 sm:$0xff]   ;;  %v755_v31 = vld [vmem:[#allocation2 + $0xb0] ss:$8 sps:$4 sm:$0xff]  }
  0x18   :  { %v756_v32 = vld [vmem:[#allocation2 + $0xa4] ss:$8 sps:$4 sm:$0xff]   ;;  %v758_v33 = vld [vmem:[#allocation2 + $0xa0] ss:$8 sps:$4 sm:$0xff]   ;;  %v759_v34 = vld [vmem:[#allocation2 + $0x94] ss:$8 sps:$4 sm:$0xff]  }
  0x19   :  { %360 = vmatpush1.bf16.msra.mxu1 %v725_v11  ;;  %v761_v35 = vld [vmem:[#allocation2 + $0x90] ss:$8 sps:$4 sm:$0xff]   ;;  %v762_v36 = vld [vmem:[#allocation2 + $0x84] ss:$8 sps:$4 sm:$0xff]   ;;  %v764_v37 = vld [vmem:[#allocation2 + $0x80] ss:$8 sps:$4 sm:$0xff]  }
  0x1a   :  { %361 = vmatprep.subr.bf16.mxu1 %v726_v12  ;;  %v765_v38 = vld [vmem:[%s939_s5 + $0x78] sm:$0xff]   ;;  %v767_v40 = vld [vmem:[%s939_s5 + $0x70] sm:$0xff]   ;;  %v769_v42 = vld [vmem:[%s939_s5 + $0x68] sm:$0xff]   ;;  %v807_v48 = vmov 1966171168   ;;  %v150_v60 = vsub.s32 0, %v135_v52 }
  0x1b   :  { %v766_v39 = vld [vmem:[%s939_s5 + $0x38] sm:$0xff]   ;;  %683 = vmatprep.subr.bf16.mxu0 %v765_v38  ;;  %v768_v41 = vld [vmem:[%s939_s5 + $0x30] sm:$0xff]   ;;  %v770_v43 = vld [vmem:[%s939_s5 + $0x28] sm:$0xff]   ;;  %v132_v49 = vunpack.c.l.s4 %v807_v48  ;;  %vm618_vm1 = vcmask 64512  }
  0x1c   :  { %684 = vmatpush3.bf16.msra.mxu0 %v766_v39  ;;  %v771_v44 = vld [vmem:[%s939_s5 + $0x60] sm:$0xff]   ;;  %v773_v46 = vld [vmem:[%s939_s5 + $0x58] sm:$0xff]   ;;  %v775_v10 = vld [vmem:[%s939_s5 + $0x50] sm:$0xff]  }
  0x1d   :  { %362 = vmatpush1.bf16.msra.mxu1 %v728_v13  ;;  %685 = vmatprep.subr.bf16.mxu0 %v767_v40  ;;  %v772_v45 = vld [vmem:[%s939_s5 + $0x20] sm:$0xff]   ;;  %v774_v47 = vld [vmem:[%s939_s5 + $0x18] sm:$0xff]   ;;  %v133_v51 = vunpack.c.0.s8 %v132_v49  ;;  %v776_v11 = vld [vmem:[%s939_s5 + $0x10] sm:$0xff]  }
  0x1e   :  { %363 = vmatprep.subr.bf16.mxu1 %v729_v14  ;;  %v632_v53 = vld.sshfl [vmem:[%s936_s2] sm:$0x11 pattern:$0x75316420]  ;;  %v777_v12 = vld [vmem:[%s939_s5 + $0x48] sm:$0xff]  }
  0x1f   :  { %v136_v54 = vsub.s32 %v133_v51, %v135_v52  ;;  %v130_v55 = vcombine.high %v632_v53, %v632_v53  ;;  %v778_v13 = vld [vmem:[%s939_s5 + $0x8] sm:$0xff]   ;;  %v779_v14 = vld [vmem:[%s939_s5 + $0x40] sm:$0xff]  }
  0x20   :  { %686 = vmatpush3.bf16.msra.mxu0 %v768_v41 }
  0x21   :  { %364 = vmatpush1.bf16.msra.mxu1 %v731_v15  ;;  %687 = vmatprep.subr.bf16.mxu0 %v769_v42  ;;  %v137_v56 = vrot.slane %v632_v53, %v136_v54  ;;  %v144_v57 = vrot.slane %v130_v55, %v136_v54  ;;  %v780_v15 = vld [vmem:[%s939_s5] sm:$0xff]  }
  0x22   :  { %365 = vmatprep.subr.bf16.mxu1 %v732_v16  ;;  %v665_v16 = vld.sshfl [vmem:[%s938_s4] sm:$0x11 pattern:$0x75316420] }
  0x23   :  { %v146_v59 = vpack.i.b16 %v137_v56, %v137_v56  ;;  %v153_v61 = vpack.i.b16 %v144_v57, %v144_v57 }
  0x24   :  { %688 = vmatpush3.bf16.msra.mxu0 %v770_v43 }
  0x25   :  { %366 = vmatpush1.bf16.msra.mxu1 %v734_v17  ;;  %689 = vmatprep.subr.bf16.mxu0 %v771_v44  ;;  %v151_v1 = vrot.slane %v146_v59, %v150_v60  ;;  %v158_v3 = vrot.slane %v153_v61, %v150_v60  ;;  %v409_v17 = vcombine.high %v665_v16, %v665_v16 }
  0x26   :  { %367 = vmatprep.subr.bf16.mxu1 %v735_v18  ;;  %v416_v18 = vrot.slane %v665_v16, %v136_v54 }
  0x28   :  { %690 = vmatpush3.bf16.msra.mxu0 %v772_v45 }
  0x29   :  { %368 = vmatpush1.bf16.msra.mxu1 %v737_v19  ;;  %691 = vmatprep.subr.bf16.mxu0 %v773_v46  ;;  %v423_v19 = vrot.slane %v409_v17, %v136_v54 }
  0x2a   :  { %369 = vmatprep.subr.bf16.mxu1 %v738_v20 }
  0x2c   :  { %692 = vmatpush3.bf16.msra.mxu0 %v774_v47 }
  0x2d   :  { %370 = vmatpush1.bf16.msra.mxu1 %v740_v21  ;;  %693 = vmatprep.subr.bf16.mxu0 %v775_v10  ;;  %v425_v21 = vpack.i.b16 %v416_v18, %v416_v18 }
  0x2e   :  { %371 = vmatprep.subr.bf16.mxu1 %v741_v22  ;;  %v432_v22 = vpack.i.b16 %v423_v19, %v423_v19 }
  0x30   :  { %694 = vmatpush3.bf16.msra.mxu0 %v776_v11 }
  0x31   :  { %372 = vmatpush2.bf16.msra.mxu1 %v743_v23  ;;  %695 = vmatprep.subr.bf16.mxu0 %v777_v12 }
  0x32   :  { %373 = vmatprep.subr.bf16.mxu1 %v744_v24 }
  0x34   :  { %696 = vmatpush3.bf16.msra.mxu0 %v778_v13 }
  0x35   :  { %374 = vmatpush2.bf16.msra.mxu1 %v746_v25  ;;  %697 = vmatprep.subr.bf16.mxu0 %v779_v14  ;;  %v430_v25 = vrot.slane %v425_v21, %v150_v60 }
  0x36   :  { %375 = vmatprep.subr.bf16.mxu1 %v747_v26 }
  0x38   :  { %698 = vmatpush3.bf16.msra.mxu0 %v780_v15 }
  0x39   :  { %376 = vmatpush2.bf16.msra.mxu1 %v749_v27  ;;  %v437_v27 = vrot.slane %v432_v22, %v150_v60 }
  0x3a   :  { %377 = vmatprep.subr.bf16.mxu1 %v750_v28 }
  0x3d   :  { %378 = vmatpush2.bf16.msra.mxu1 %v752_v29 }
  0x3e   :  { %379 = vmatprep.subr.bf16.mxu1 %v753_v30 }
  0x41   :  { %380 = vmatpush2.bf16.msra.mxu1 %v755_v31 }
  0x42   :  { %381 = vmatprep.subr.bf16.mxu1 %v756_v32 }
  0x45   :  { %382 = vmatpush2.bf16.msra.mxu1 %v758_v33 }
  0x46   :  { %383 = vmatprep.subr.bf16.mxu1 %v759_v34 }
  0x49   :  { %384 = vmatpush2.bf16.msra.mxu1 %v761_v35  ;;  %v666_v35 = vld [vmem:[%s940_s6] ss:$0 sm:$0xff] }
  0x4a   :  { %385 = vmatprep.subr.bf16.mxu1 %v762_v36 }
  0x4d   :  { %386 = vmatpush2.bf16.msra.mxu1 %v764_v37 }
  0xd6   :  { %v110_v58 = vpop.f32.mrf.mxu0 }
  0xd8   :  { %v112_v62 = vpop.f32.mrf.mxu0 }
  0xda   :  { %v114_v63 = vpop.f32.mrf.mxu0 }
  0xdb   :  { %v119_v2 = vpack.c.bf16 %v114_v63, %v110_v58 }
  0xdc   :  { %v116_v4 = vpop.f32.mrf.mxu0 }
  0xdd   :  { %v120_v5 = vpack.c.bf16 %v116_v4, %v112_v62  ;;  %v159_v6 = vadd.bf16 %v151_v1, %v119_v2 }
  0xdf   :  { %v160_v7 = vadd.bf16 %v158_v3, %v120_v5  ;;  %v161_v9 = vmax.bf16 %v806_v0, %v159_v6 }
  0xe1   :  { %v162_v8 = vmax.bf16 %v806_v0, %v160_v7 }
  0xe3   :  { %387 = vmatprep.mubr.bf16.mxu1 %v162_v8 }
  0xe4   :  { %388 = vmatmul.mubr.bf16.vlgmr.msra.gmra.mxu1 %v161_v9 }
 0x1a4   :  { %v389_v20 = vpop.f32.mrf.mxu1 }
 0x1a6   :  { %v391_v23 = vpop.f32.mrf.mxu1 }
 0x1a8   :  { %v393_v24 = vpop.f32.mrf.mxu1 }
 0x1a9   :  { %v398_v26 = vpack.c.bf16 %v393_v24, %v389_v20 }
 0x1aa   :  { %v395_v28 = vpop.f32.mrf.mxu1 }
 0x1ab   :  { %v399_v29 = vpack.c.bf16 %v395_v28, %v391_v23  ;;  %v438_v30 = vadd.bf16 %v430_v25, %v398_v26 }
 0x1ad   :  { %v439_v31 = vadd.bf16 %v437_v27, %v399_v29  ;;  %v440_v33 = vmax.bf16 %v806_v0, %v438_v30 }
 0x1af   :  { %v441_v32 = vmax.bf16 %v806_v0, %v439_v31 }
 0x1b1   :  { %609 = vmatprep.mubr.bf16.mxu0 %v441_v32 }
 0x1b2   :  { %610 = vmatmul.mubr.bf16.vlgmr.msra.gmra.mxu0 %v440_v33 }
 0x272   :  { %v699_v34 = vpop.f32.mrf.mxu0 }
 0x274   :  { %v700_v36 = vpop.f32.mrf.mxu0 }
 0x275   :  { %v701_v37 = vadd.f32 %v700_v36, %v699_v34 }
 0x276   :  { %v702_v38 = vpop.f32.mrf.mxu0 }
 0x277   :  { %v612_v39 = vadd.f32 %v701_v37, %v666_v35 }
 0x278   :  { %v703_v40 = vpop.f32.mrf.mxu0 }
 0x279   :  { %619 = vst.msk [vmem:[%s941_s7] sm:$0xff] %vm618_vm1, %v612_v39  ;;  %v704_v41 = vadd.f32 %v703_v40, %v702_v38 }
 0x27b   :  { %v615_v42 = vadd.f32 %v704_v41, %v666_v35 }
 0x27d   :  { %620 = vst.msk [vmem:[%s941_s7 + $0x8] sm:$0xff] %vm618_vm1, %v615_v42 }
 0x27e   :  { %625 = vsyncpa [#allocation3], 1 }

</bundles_post_ra>
